<compile_context>
chip_gen: v7x
topology: tpu7x:2x2x1
jax: 0.10.0
libtpu: 0.0.40
codegen_flags: <defaults>
</compile_context>

<pallas_src>
import math
import functools

import jax
import jax.numpy as jnp
from jax.experimental import pallas as pl
from jax.experimental.pallas import tpu as pltpu


VMEM_LIMIT = 48 * 1024 * 1024  # v7x-safe (64 MiB physical); plenty for these tiles.


# ----------------------------------------------------------------------------
# Shared math helpers
# ----------------------------------------------------------------------------
def _layernorm(x, g, b, eps=1e-5):
    mu = jnp.mean(x, axis=-1, keepdims=True)
    var = jnp.mean((x - mu) ** 2, axis=-1, keepdims=True)
    return (x - mu) * jax.lax.rsqrt(var + eps) * g + b


def _pick_tile(dim, target, align):
    """Largest tile <= target that divides `dim` and is a multiple of `align`;
    falls back to the full dim (always legal for BlockSpec)."""
    if dim <= target:
        return dim
    t = (target // align) * align
    while t >= align:
        if dim % t == 0:
            return t
        t -= align
    return dim


# ----------------------------------------------------------------------------
# Pallas kernels
# ----------------------------------------------------------------------------
def linear_kernel(*refs, activation, has_residual):
    """out = x @ w + b (+ residual) (optional ReLU); bf16 MXU inputs, f32 acc."""
    if has_residual:
        x_ref, w_ref, b_ref, r_ref, o_ref, acc_ref = refs
    else:
        x_ref, w_ref, b_ref, o_ref, acc_ref = refs
        r_ref = None
    k = pl.program_id(2)

    @pl.when(k == 0)
    def _init():
        acc_ref[...] = jnp.zeros_like(acc_ref)

    acc_ref[...] += jnp.dot(x_ref[...], w_ref[...],
                            preferred_element_type=jnp.float32)

    @pl.when(k == pl.num_programs(2) - 1)
    def _finalize():
        out = acc_ref[...] + b_ref[...]
        if has_residual:
            out = out + r_ref[...].astype(jnp.float32)
        if activation == "relu":
            out = jnp.maximum(out, 0.0)
        o_ref[...] = out.astype(o_ref.dtype)


def flash_attn_kernel(q_ref, k_ref, v_ref, o_ref, m_ref, l_ref, acc_ref, *,
                      scale, num_heads, head_dim):
    """Causal flash attention.  Grid = (B, q_tiles, kv_tiles).  Q/K/V arrive in
    (B, S, E) layout; heads are split via static column slices inside the kernel
    (no XLA transposes).  Online-softmax state per head lives in VMEM scratch."""
    qi = pl.program_id(1)
    ki = pl.program_id(2)
    tq = q_ref.shape[1]
    tkv = k_ref.shape[1]

    @pl.when(ki == 0)
    def _init():
        m_ref[...] = jnp.full_like(m_ref, -1e30)
        l_ref[...] = jnp.zeros_like(l_ref)
        acc_ref[...] = jnp.zeros_like(acc_ref)

    # Skip KV tiles that lie entirely in the masked future of this query tile.
    # (The K/V index_maps are clamped so these tiles aren't even DMA'd.)
    @pl.when(ki * tkv <= qi * tq + (tq - 1))
    def _compute():
        row = qi * tq + jax.lax.broadcasted_iota(jnp.int32, (tq, tkv), 0)
        col = ki * tkv + jax.lax.broadcasted_iota(jnp.int32, (tq, tkv), 1)
        causal = col <= row

        q_all = q_ref[0]                                  # (tq, E)  bf16
        k_all = k_ref[0]                                  # (tkv, E) bf16
        v_all = v_ref[0]                                  # (tkv, E) bf16

        for h in range(num_heads):                        # unrolled, static slices
            sl = slice(h * head_dim, (h + 1) * head_dim)
            q = q_all[:, sl]
            k = k_all[:, sl]
            v = v_all[:, sl]
            # Contract last dims of both operands -> no explicit K transpose.
            s = jax.lax.dot_general(q, k, (((1,), (1,)), ((), ())),
                                    preferred_element_type=jnp.float32) * scale
            s = jnp.where(causal, s, -1e30)

            m_prev = m_ref[h]                             # (tq, 1)
            m_new = jnp.maximum(m_prev, jnp.max(s, axis=-1, keepdims=True))
            alpha = jnp.exp(m_prev - m_new)
            # f32 exp kept (portable to v5e; v6e/v7x could use a bf16 EUP path).
            p = jnp.exp(s - m_new)
            l_ref[h] = alpha * l_ref[h] + jnp.sum(p, axis=-1, keepdims=True)
            acc_ref[h] = alpha * acc_ref[h] + jnp.dot(
                p.astype(jnp.bfloat16), v, preferred_element_type=jnp.float32)
            m_ref[h] = m_new

    @pl.when(ki == pl.num_programs(2) - 1)
    def _finalize():
        outs = []
        for h in range(num_heads):
            inv_l = pl.reciprocal(l_ref[h], approx=True)   # EUP, frees VALU slots
            outs.append(acc_ref[h] * inv_l)
        o_ref[0] = jnp.concatenate(outs, axis=-1).astype(o_ref.dtype)


def layernorm_kernel(x_ref, g_ref, b_ref, o_ref, *, eps):
    x = x_ref[...].astype(jnp.float32)
    o_ref[...] = _layernorm(x, g_ref[...], b_ref[...], eps).astype(o_ref.dtype)


# ----------------------------------------------------------------------------
# pallas_call wrappers
# ----------------------------------------------------------------------------
def _linear(x2d, w, b, *, residual=None, activation=None,
            out_dtype=jnp.bfloat16, tm=512, tn=512, tk=1024):
    M, K = x2d.shape
    _, N = w.shape
    tm = _pick_tile(M, tm, 16)    # bf16 sublane alignment = 16
    tn = _pick_tile(N, tn, 128)
    tk = _pick_tile(K, tk, 128)
    grid = (M // tm, N // tn, K // tk)

    in_specs = [
        pl.BlockSpec((tm, tk), lambda i, j, k: (i, k)),
        pl.BlockSpec((tk, tn), lambda i, j, k: (k, j)),
        pl.BlockSpec((1, tn), lambda i, j, k: (0, j)),
    ]
    inputs = [x2d, w, b]
    if residual is not None:
        in_specs.append(pl.BlockSpec((tm, tn), lambda i, j, k: (i, j)))
        inputs.append(residual)

    return pl.pallas_call(
        functools.partial(linear_kernel, activation=activation,
                          has_residual=residual is not None),
        out_shape=jax.ShapeDtypeStruct((M, N), out_dtype),
        grid=grid,
        in_specs=in_specs,
        out_specs=pl.BlockSpec((tm, tn), lambda i, j, k: (i, j)),
        scratch_shapes=[pltpu.VMEM((tm, tn), jnp.float32)],
        compiler_params=pltpu.CompilerParams(
            dimension_semantics=("parallel", "parallel", "arbitrary"),
            vmem_limit_bytes=VMEM_LIMIT),
    )(*inputs)


def _flash_attention(q, k, v, num_heads, *, tq=128, tkv=256):
    B, S, E = q.shape
    hd = E // num_heads
    tq = _pick_tile(S, tq, 16)
    tkv = _pick_tile(S, tkv, 16)
    grid = (B, S // tq, S // tkv)
    scale = 1.0 / math.sqrt(hd)

    # Clamp the kv block index so causally-dead tiles are never DMA'd
    # (repeated block index -> no new DMA issued by the pipeline).
    def kv_index(b, qi, ki):
        return (b, jnp.minimum(ki, (qi * tq + tq - 1) // tkv), 0)

    return pl.pallas_call(
        functools.partial(flash_attn_kernel, scale=scale,
                          num_heads=num_heads, head_dim=hd),
        out_shape=jax.ShapeDtypeStruct((B, S, E), jnp.bfloat16),
        grid=grid,
        in_specs=[
            pl.BlockSpec((1, tq, E), lambda b, qi, ki: (b, qi, 0)),
            pl.BlockSpec((1, tkv, E), kv_index),
            pl.BlockSpec((1, tkv, E), kv_index),
        ],
        out_specs=pl.BlockSpec((1, tq, E), lambda b, qi, ki: (b, qi, 0)),
        scratch_shapes=[pltpu.VMEM((num_heads, tq, 1), jnp.float32),
                        pltpu.VMEM((num_heads, tq, 1), jnp.float32),
                        pltpu.VMEM((num_heads, tq, hd), jnp.float32)],
        compiler_params=pltpu.CompilerParams(
            dimension_semantics=("parallel", "parallel", "arbitrary"),
            vmem_limit_bytes=VMEM_LIMIT),
    )(q, k, v)


def _layernorm_call(x2d, g, b, *, tm=512, eps=1e-5):
    M, E = x2d.shape
    tm = _pick_tile(M, tm, 16)
    grid = (M // tm,)
    return pl.pallas_call(
        functools.partial(layernorm_kernel, eps=eps),
        out_shape=jax.ShapeDtypeStruct((M, E), jnp.bfloat16),
        grid=grid,
        in_specs=[pl.BlockSpec((tm, E), lambda i: (i, 0)),
                  pl.BlockSpec((1, E), lambda i: (0, 0)),
                  pl.BlockSpec((1, E), lambda i: (0, 0))],
        out_specs=pl.BlockSpec((tm, E), lambda i: (i, 0)),
        compiler_params=pltpu.CompilerParams(
            dimension_semantics=("parallel",),
            vmem_limit_bytes=VMEM_LIMIT),
    )(x2d, g, b)


# ----------------------------------------------------------------------------
# Full forward pass
# ----------------------------------------------------------------------------
def gpt_forward(params, tokens, num_heads):
    B, S = tokens.shape
    # Embedding lookups are gathers (glue) done in plain JAX.
    x = params["tok_emb"][tokens] + params["pos_emb"][jnp.arange(S)][None]
    E = x.shape[-1]
    x2d = x.reshape(B * S, E).astype(jnp.bfloat16)        # bf16 activations

    for layer in params["layers"]:
        # Three tiled projections -> (B*S, E) bf16 each; reshape to (B,S,E) is free.
        q = _linear(x2d, layer["wq"], layer["bq"]).reshape(B, S, E)
        k = _linear(x2d, layer["wk"], layer["bk"]).reshape(B, S, E)
        v = _linear(x2d, layer["wv"], layer["bv"]).reshape(B, S, E)

        o = _flash_attention(q, k, v, num_heads)           # (B, S, E) bf16
        o2d = o.reshape(B * S, E)                          # free view

        # Output projection with residual fused into the epilogue.
        attn_res = _linear(o2d, layer["wo"], layer["bo"], residual=x2d)
        x1 = _layernorm_call(attn_res, layer["ln1_g"], layer["ln1_b"])

        h1 = _linear(x1, layer["w1"], layer["b1"], activation="relu")
        h2_res = _linear(h1, layer["w2"], layer["b2"], residual=x1)
        x2d = _layernorm_call(h2_res, layer["ln2_g"], layer["ln2_b"])

    # Tiled vocab head; logits kept in f32.
    logits = _linear(x2d, params["w_out"], params["b_out"], out_dtype=jnp.float32)
    return logits.reshape(B, S, -1)


# ----------------------------------------------------------------------------
# Pure-JAX reference (same math / dtype plan: bf16 activations, f32 acc & stats)
# ----------------------------------------------------------------------------
def gpt_forward_ref(params, tokens, num_heads):
    B, S = tokens.shape
    x = params["tok_emb"][tokens] + params["pos_emb"][jnp.arange(S)][None]
    E = x.shape[-1]
    hd = E // num_heads
    causal = jnp.arange(S)[None, :] <= jnp.arange(S)[:, None]
    scale = 1.0 / math.sqrt(hd)
    bf = jnp.bfloat16

    def mm(a, w):
        return jnp.dot(a.astype(bf), w.astype(bf), preferred_element_type=jnp.float32)

    x = x.astype(bf)
    for layer in params["layers"]:
        q = (mm(x, layer["wq"]) + layer["bq"]).astype(bf)
        k = (mm(x, layer["wk"]) + layer["bk"]).astype(bf)
        v = (mm(x, layer["wv"]) + layer["bv"]).astype(bf)
        qh = q.reshape(B, S, num_heads, hd).transpose(0, 2, 1, 3)
        kh = k.reshape(B, S, num_heads, hd).transpose(0, 2, 1, 3)
        vh = v.reshape(B, S, num_heads, hd).transpose(0, 2, 1, 3)
        s = jnp.einsum("bhqd,bhkd->bhqk", qh, kh,
                       preferred_element_type=jnp.float32) * scale
        s = jnp.where(causal[None, None], s, -1e30)
        m = jnp.max(s, axis=-1, keepdims=True)
        p = jnp.exp(s - m)
        l = jnp.sum(p, axis=-1, keepdims=True)
        o = jnp.einsum("bhqk,bhkd->bhqd", p.astype(bf), vh,
                       preferred_element_type=jnp.float32) / l
        o = o.transpose(0, 2, 1, 3).reshape(B, S, E).astype(bf)

        attn_res = (mm(o, layer["wo"]) + layer["bo"] + x.astype(jnp.float32)).astype(bf)
        x1 = _layernorm(attn_res.astype(jnp.float32),
                        layer["ln1_g"], layer["ln1_b"]).astype(bf)
        h1 = jnp.maximum(mm(x1, layer["w1"]) + layer["b1"], 0.0).astype(bf)
        h2_res = (mm(h1, layer["w2"]) + layer["b2"] + x1.astype(jnp.float32)).astype(bf)
        x = _layernorm(h2_res.astype(jnp.float32),
                       layer["ln2_g"], layer["ln2_b"]).astype(bf)
    return mm(x, params["w_out"]) + params["b_out"]


# ----------------------------------------------------------------------------
# Parameter construction (deterministic, synthetic). Matmul weights stored bf16.
# ----------------------------------------------------------------------------
def init_params(key, vocab_size, embed_size, num_heads, num_layers, max_length):
    ff = embed_size * 4

    def nrm(k, shape, scale=0.02):
        return (scale * jax.random.normal(k, shape)).astype(jnp.float32)

    keys = jax.random.split(key, 3 + num_layers)
    params = {
        "tok_emb": nrm(keys[0], (vocab_size, embed_size)),
        "pos_emb": nrm(keys[1], (max_length, embed_size)),
        "w_out": nrm(keys[2], (embed_size, vocab_size)).astype(jnp.bfloat16),
        "b_out": jnp.zeros((1, vocab_size), jnp.float32),
        "layers": [],
    }
    for l in range(num_layers):
        lk = jax.random.split(keys[3 + l], 6)
        params["layers"].append({
            "wq": nrm(lk[0], (embed_size, embed_size)).astype(jnp.bfloat16),
            "bq": jnp.zeros((1, embed_size), jnp.float32),
            "wk": nrm(lk[1], (embed_size, embed_size)).astype(jnp.bfloat16),
            "bk": jnp.zeros((1, embed_size), jnp.float32),
            "wv": nrm(lk[2], (embed_size, embed_size)).astype(jnp.bfloat16),
            "bv": jnp.zeros((1, embed_size), jnp.float32),
            "wo": nrm(lk[3], (embed_size, embed_size)).astype(jnp.bfloat16),
            "bo": jnp.zeros((1, embed_size), jnp.float32),
            "ln1_g": jnp.ones((1, embed_size), jnp.float32),
            "ln1_b": jnp.zeros((1, embed_size), jnp.float32),
            "w1": nrm(lk[4], (embed_size, ff)).astype(jnp.bfloat16),
            "b1": jnp.zeros((1, ff), jnp.float32),
            "w2": nrm(lk[5], (ff, embed_size)).astype(jnp.bfloat16),
            "b2": jnp.zeros((1, embed_size), jnp.float32),
            "ln2_g": jnp.ones((1, embed_size), jnp.float32),
            "ln2_b": jnp.zeros((1, embed_size), jnp.float32),
        })
    return params


# ----------------------------------------------------------------------------
if __name__ == "__main__":
    vocab_size, embed_size, num_heads, num_layers, max_length = 64, 32, 4, 2, 16
    batch, seq = 2, 8

    key = jax.random.PRNGKey(0)
    pkey, tkey = jax.random.split(key)
    params = init_params(pkey, vocab_size, embed_size, num_heads, num_layers, max_length)
    tokens = jax.random.randint(tkey, (batch, seq), 0, vocab_size, dtype=jnp.int32)

    logits = gpt_forward(params, tokens, num_heads)
    logits = jax.block_until_ready(logits)
    assert logits.shape == (batch, seq, vocab_size)

    ref = gpt_forward_ref(params, tokens, num_heads)
    # Tolerance covers approx-reciprocal softmax normalization + bf16 rounding order.
    assert jnp.allclose(logits, ref, rtol=2e-2, atol=2e-2), "mismatch vs reference"

    print("KERNEL_OK")
</pallas_src>

<mosaic_0001>
module attributes {stable_mosaic.version = 11 : i64} {
  func.func @linear_kernel(%arg0: i32, %arg1: i32, %arg2: i32, %arg3: memref<16x32xbf16, #tpu.memory_space<vmem>>, %arg4: memref<32x32xbf16, #tpu.memory_space<vmem>>, %arg5: memref<1x32xf32, #tpu.memory_space<vmem>>, %arg6: memref<16x32xbf16, #tpu.memory_space<vmem>>, %arg7: memref<16x32xf32, #tpu.memory_space<vmem>>) attributes {dimension_semantics = [#tpu.dimension_semantics<parallel>, #tpu.dimension_semantics<parallel>, #tpu.dimension_semantics<arbitrary>], iteration_bounds = array<i64: 1, 1, 1>, scalar_prefetch = 0 : i64, scratch_operands = 1 : i64, tpu.core_type = #tpu.core_type<tc>, window_params = [{transform_indices = @transform_0, window_bounds = array<i64: 16, 32>}, {transform_indices = @transform_1, window_bounds = array<i64: 32, 32>}, {transform_indices = @transform_2, window_bounds = array<i64: 1, 32>}, {transform_indices = @transform_3, window_bounds = array<i64: 16, 32>}]} {
    %c0_i32 = arith.constant 0 : i32
    %0 = arith.cmpi eq, %arg2, %c0_i32 : i32
    %1 = arith.extui %0 : i1 to i32
    %c0_i32_0 = arith.constant 0 : i32
    %2 = arith.cmpi ne, %1, %c0_i32_0 : i32
    scf.if %2 {
      %cst_10 = arith.constant 0.000000e+00 : f32
      %12 = vector.broadcast %cst_10 : f32 to vector<16x32xf32>
      %c0_11 = arith.constant 0 : index
      %c0_12 = arith.constant 0 : index
      %13 = vector.load %arg7[%c0_11, %c0_12] : memref<16x32xf32, #tpu.memory_space<vmem>>, vector<16x32xf32>
      tpu.vector_store %arg7[%c0_11, %c0_12], %12 {strides = array<i32>} : memref<16x32xf32, #tpu.memory_space<vmem>>, vector<16x32xf32>,
    } else {
    }
    %c0 = arith.constant 0 : index
    %c0_1 = arith.constant 0 : index
    %3 = vector.load %arg7[%c0, %c0_1] : memref<16x32xf32, #tpu.memory_space<vmem>>, vector<16x32xf32>
    %c0_2 = arith.constant 0 : index
    %c0_3 = arith.constant 0 : index
    %4 = vector.load %arg3[%c0_2, %c0_3] : memref<16x32xbf16, #tpu.memory_space<vmem>>, vector<16x32xbf16>
    %c0_4 = arith.constant 0 : index
    %c0_5 = arith.constant 0 : index
    %5 = vector.load %arg4[%c0_4, %c0_5] : memref<32x32xbf16, #tpu.memory_space<vmem>>, vector<32x32xbf16>
    %cst = arith.constant dense<0.000000e+00> : vector<16x32xf32>
    %6 = tpu.matmul %4, %5, %cst {dimension_numbers = #tpu.dot_dimension_numbers<[1], [0], [0], [1], [0, 0, 1, 1], [], []>} : vector<16x32xbf16>, vector<32x32xbf16>, vector<16x32xf32> -> vector<16x32xf32>
    %7 = arith.addf %3, %6 : vector<16x32xf32>
    %c0_6 = arith.constant 0 : index
    %c0_7 = arith.constant 0 : index
    %8 = vector.load %arg7[%c0_6, %c0_7] : memref<16x32xf32, #tpu.memory_space<vmem>>, vector<16x32xf32>
    tpu.vector_store %arg7[%c0_6, %c0_7], %7 {strides = array<i32>} : memref<16x32xf32, #tpu.memory_space<vmem>>, vector<16x32xf32>,
    %c0_i32_8 = arith.constant 0 : i32
    %9 = arith.cmpi eq, %arg2, %c0_i32_8 : i32
    %10 = arith.extui %9 : i1 to i32
    %c0_i32_9 = arith.constant 0 : i32
    %11 = arith.cmpi ne, %10, %c0_i32_9 : i32
    scf.if %11 {
      %c0_10 = arith.constant 0 : index
      %c0_11 = arith.constant 0 : index
      %12 = vector.load %arg7[%c0_10, %c0_11] : memref<16x32xf32, #tpu.memory_space<vmem>>, vector<16x32xf32>
      %c0_12 = arith.constant 0 : index
      %c0_13 = arith.constant 0 : index
      %13 = vector.load %arg5[%c0_12, %c0_13] : memref<1x32xf32, #tpu.memory_space<vmem>>, vector<1x32xf32>
      %14 = vector.broadcast %13 : vector<1x32xf32> to vector<16x32xf32>
      %15 = arith.addf %12, %14 : vector<16x32xf32>
      %16 = arith.truncf %15 : vector<16x32xf32> to vector<16x32xbf16>
      %c0_14 = arith.constant 0 : index
      %c0_15 = arith.constant 0 : index
      %17 = vector.load %arg6[%c0_14, %c0_15] : memref<16x32xbf16, #tpu.memory_space<vmem>>, vector<16x32xbf16>
      tpu.vector_store %arg6[%c0_14, %c0_15], %16 {strides = array<i32>} : memref<16x32xbf16, #tpu.memory_space<vmem>>, vector<16x32xbf16>,
    } else {
    }
    return
  }
  func.func @transform_0(%arg0: i32, %arg1: i32, %arg2: i32) -> (i32, i32) {
    %c0_i32 = arith.constant 0 : i32
    return %arg0, %arg2 : i32, i32
  }
  func.func @transform_1(%arg0: i32, %arg1: i32, %arg2: i32) -> (i32, i32) {
    %c0_i32 = arith.constant 0 : i32
    return %arg2, %arg1 : i32, i32
  }
  func.func @transform_2(%arg0: i32, %arg1: i32, %arg2: i32) -> (i32, i32) {
    %c0_i32 = arith.constant 0 : i32
    %c0_i32_0 = arith.constant 0 : i32
    return %c0_i32, %arg1 : i32, i32
  }
  func.func @transform_3(%arg0: i32, %arg1: i32, %arg2: i32) -> (i32, i32) {
    %c0_i32 = arith.constant 0 : i32
    return %arg0, %arg1 : i32, i32
  }
}

</mosaic_0001>

<bundles_post_ra>
// kernel: tpu_custom_call.1
= control target key start
LH: loop header
LB: loop body
LE: loop exit
PB: predicated region body
PF: predicated region fallthrough
CT: control target
= control target key end

     0   :  { %8 = vsyncpa [#allocation4], 0  ;;  %s350_s0 = inlined_call_operand.hbm [shape: bf16[16,32], index: 0, kind: input, shape index: {}]   ;;  %s351_s1 = inlined_call_operand.hbm [shape: bf16[32,32], index: 1, kind: input, shape index: {}]   ;;  %s352_s2 = inlined_call_operand.vmem [shape: f32[1,32], index: 2, kind: input, shape index: {}]   ;;  %s353_s3 = inlined_call_operand.hbm [shape: bf16[16,32], index: 3, kind: output, shape index: {}]  }
   0x1   :  { %9 = vsyncpa [#allocation7], 0 }
   0x2   :  { %10 = vsyncpa [#allocation5], 0  ;;  %s270_s12 = smov [#allocation3]   ;;  %s198_s16 = scalar_lea.hbm %s350_s0, 128 }
   0x3   :  { %s16_s13 = sshll.u32 %s270_s12, 4  ;;  %p199_p0 = scmp.ne.s32.totalorder %s350_s0, %s198_s16  ;;  %s17_s13 = int_to_ptr.vmem [resolvable:$true] %s16_s13 }
   0x4   :  { %p202_p1 = scmp.lt.u32.totalorder %s198_s16, %s350_s0 }
   0x6   :  { %p204_p2 = pnand %p202_p1, %p199_p0 }
   0x8   :  { %207 = shalt.err (!%p204_p2)
}
   0x9   :  { %s208_s21 = scalar_lea.vmem %s17_s13, 128  ;;  %p213_p4 = scmp.lt.s32.totalorder %s17_s13, %s17_s13 }
   0xa   :  { %p209_p3 = scmp.ne.s32.totalorder %s17_s13, %s208_s21  ;;  %p214_p5 = scmp.lt.s32.totalorder %s208_s21, %s208_s21 }
   0xc   :  { %p215_p6 = por %p214_p5, %p213_p4 }
   0xe   :  { %p216_p7 = pnand %p215_p6, %p209_p3 }
  0x10   :  { %219 = shalt.err (!%p216_p7)
}
  0x11   :  { %s271_s22 = smov 64   ;;  %s272_s23 = smov 4  }
  0x12   :  { %22 = dma.hbm_to_vmem [thread:$0]  %s350_s0, 128, %s17_s13, [#allocation4], %s271_s22, %s271_s22, %s272_s23  }
  0x13   :  { %s273_s26 = smov [#allocation6]   ;;  %s220_s30 = scalar_lea.hbm %s351_s1, 256 }
  0x14   :  { %s28_s27 = sshll.u32 %s273_s26, 4  ;;  %p221_p8 = scmp.ne.s32.totalorder %s351_s1, %s220_s30  ;;  %s29_s27 = int_to_ptr.vmem [resolvable:$true] %s28_s27 }
  0x15   :  { %p224_p9 = scmp.lt.u32.totalorder %s220_s30, %s351_s1 }
  0x17   :  { %p226_p10 = pnand %p224_p9, %p221_p8 }
  0x19   :  { %229 = shalt.err (!%p226_p10)
}
  0x1a   :  { %s230_s8 = scalar_lea.vmem %s29_s27, 256  ;;  %p235_p12 = scmp.lt.s32.totalorder %s29_s27, %s29_s27 }
  0x1b   :  { %p231_p11 = scmp.ne.s32.totalorder %s29_s27, %s230_s8  ;;  %p236_p13 = scmp.lt.s32.totalorder %s230_s8, %s230_s8 }
  0x1d   :  { %p237_p0 = por %p236_p13, %p235_p12 }
  0x1f   :  { %p238_p1 = pnand %p237_p0, %p231_p11 }
  0x21   :  { %241 = shalt.err (!%p238_p1)
}
  0x22   :  { %34 = dma.hbm_to_vmem [thread:$0]  %s351_s1, 256, %s29_s27, [#allocation7], %s271_s22, %s271_s22, %s272_s23  }
  0x23   :  { %264 = dma.done.wait [#allocation4], 128  }
  0x24   :  { %265 = vsyncadd [#allocation4], 4294967168 }
  0x25   :  { %266 = dma.done.wait [#allocation7], 256  }
  0x26   :  { %267 = vsyncadd [#allocation7], 4294967040  ;;  %vm48_vm0 = vcmask 261120   ;;  %v274_v0 = vmov 0.0   ;;  %vm275_vm1 = vmmov 0   ;;  %v195_v1 = vld [vmem:[#allocation6] sm:$0xff]  }
  0x27   :  { %180 = vmatprep.subr.bf16.mxu0 %v274_v0  ;;  %184 = vmatprep.mubr.msk.bf16.mxu0 %vm275_vm1, %v274_v0  ;;  %49 = vst.msk [vmem:[#allocation2] sm:$0xff] %vm48_vm0, %v274_v0  ;;  %50 = vst.msk [vmem:[#allocation2 + $0x8] sm:$0xff] %vm48_vm0, %v274_v0  ;;  %v196_v2 = vld [vmem:[#allocation6 + $0x8] sm:$0xff]   ;;  %v197_v3 = vld [vmem:[#allocation3] sm:$0xff]   ;;  %vm147_vm2 = vcmask 257024   ;;  %s276_s11 = smov [#allocation8]  }
  0x28   :  { %181 = vmatpush3.bf16.msra.mxu0 %v195_v1  ;;  %v172_v12 = vld [vmem:[%s352_s2] ss:$0 sm:$0xff]  ;;  %s155_s12 = sshll.u32 %s276_s11, 4  ;;  %s156_s12 = int_to_ptr.vmem [resolvable:$true] %s155_s12 }
  0x29   :  { %182 = vmatprep.subr.bf16.mxu0 %v274_v0  ;;  %s242_s13 = scalar_lea.vmem %s156_s12, 128  ;;  %p247_p3 = scmp.lt.s32.totalorder %s156_s12, %s156_s12 }
  0x2a   :  { %p243_p2 = scmp.ne.s32.totalorder %s156_s12, %s242_s13  ;;  %p248_p4 = scmp.lt.s32.totalorder %s242_s13, %s242_s13 }
  0x2c   :  { %183 = vmatpush3.bf16.msra.mxu0 %v196_v2  ;;  %p249_p5 = por %p248_p4, %p247_p3 }
  0x2e   :  { %v51_v4 = vld [vmem:[#allocation2] sm:$0xff]  ;;  %v52_v6 = vld [vmem:[#allocation2 + $0x8] sm:$0xff]  ;;  %p250_p6 = pnand %p249_p5, %p243_p2 }
  0x2f   :  { %185 = vmatmul.mubr.msk.bf16.vlgmr.msra.gmra.mrb[0].mxu0 %vm48_vm0, %v197_v3 }
 0x102   :  { %v114_v5 = vpop.f32.mrb[0].mxu0 }
 0x103   :  { %v121_v7 = vadd.f32 %v114_v5, %v51_v4  ;;  %v186_v8 = vpop.f32.mrb[1].mxu0 }
 0x104   :  { %v117_v9 = vpop.f32.mrb[2].mxu0 }
 0x105   :  { %123 = vst.msk [vmem:[#allocation2] sm:$0xff] %vm48_vm0, %v121_v7  ;;  %v122_v10 = vadd.f32 %v117_v9, %v52_v6  ;;  %v187_v11 = vpop.f32.mrb[3].mxu0 }
 0x107   :  { %124 = vst.msk [vmem:[#allocation2 + $0x8] sm:$0xff] %vm48_vm0, %v122_v10 }
 0x10c   :  { %v128_v13 = vld [vmem:[#allocation2] sm:$0xff] }
 0x10d   :  { %v137_v14 = vadd.f32 %v172_v12, %v128_v13 }
 0x10e   :  { %v129_v15 = vld [vmem:[#allocation2 + $0x8] sm:$0xff] }
 0x10f   :  { %v138_v16 = vadd.f32 %v172_v12, %v129_v15  ;;  %v175_v17 = vpack.c.bf16 %v137_v14, %v137_v14 }
 0x111   :  { %v176_v18 = vpack.c.bf16 %v138_v16, %v138_v16  ;;  %148 = vst.msk [vmem:[#allocation8] sm:$0xf] %vm147_vm2, %v175_v17 }
 0x113   :  { %149 = vst.msk [vmem:[#allocation8 + $0x4] sm:$0xf] %vm147_vm2, %v176_v18 }
 0x114   :  { %253 = shalt.err (!%p250_p6)
}
 0x115   :  { %s254_s15 = scalar_lea.hbm %s353_s3, 128 }
 0x116   :  { %p255_p7 = scmp.ne.s32.totalorder %s353_s3, %s254_s15  ;;  %p258_p8 = scmp.lt.u32.totalorder %s254_s15, %s353_s3 }
 0x118   :  { %p260_p9 = pnand %p258_p8, %p255_p7 }
 0x11a   :  { %263 = shalt.err (!%p260_p9)
}
 0x11b   :  { %161 = dma.vmem_to_hbm [thread:$0]  %s156_s12, 128, %s353_s3, [#allocation5], %s271_s22, %s271_s22, %s272_s23  }
 0x11c   :  { %268 = dma.done.wait [#allocation5], 128  }
 0x11d   :  { %269 = vsyncadd [#allocation5], 4294967168 }
 0x11e   :  { %165 = vsyncpa [#allocation4], 1 }
 0x11f   :  { %166 = vsyncpa [#allocation7], 1 }
 0x120   :  { %167 = vsyncpa [#allocation5], 1 }

</bundles_post_ra>
